<compile_context>
chip_gen: v5e
topology: v5e:2x2
jax: 0.10.0
libtpu: 0.0.40
codegen_flags: <defaults>
</compile_context>

<pallas_src>
import jax
import jax.numpy as jnp
from jax.experimental import pallas as pl
from jax.experimental.pallas import tpu as pltpu


def fc_head_2_kernel(x_ref, w_ref, b_ref, o_ref):
    # x_ref: (bb, L)      -- raw pre-pool input rows (pool folded into w_ref)
    # w_ref: (L, n_out)   -- pool-folded, pre-transposed Linear weight (VMEM-resident)
    # b_ref: (1, n_out)   -- bias row (VMEM-resident)
    # o_ref: (bb, n_out)
    o_ref[...] = (
        jnp.dot(x_ref[...], w_ref[...], preferred_element_type=jnp.float32)
        + b_ref[...]
    ).astype(o_ref.dtype)


def prepare_fc_head_2_params(weight, bias):
    """One-time parameter prep (hoisted out of the hot path).

    weight: (output_num, input_num) PyTorch-style Linear weight
    bias:   (output_num,)
    Returns (w_eff, b_row):
      w_eff: (4*input_num, output_num)  -- AvgPool1d(4, stride=4) folded in
      b_row: (1, output_num)
    """
    n_out, n_in = weight.shape
    w_eff = jnp.repeat(weight.T, 4, axis=0) * 0.25   # (4*n_in, n_out)
    b_row = bias.reshape(1, n_out)
    return w_eff, b_row


def _default_block_b(L, dtype):
    """Rows of x per grid step: ~8 MiB of x per tile (4 MiB on v5e)."""
    try:
        kind = jax.devices()[0].device_kind.lower()
    except Exception:
        kind = ""
    # Keep double-buffered x comfortably under the default scoped-VMEM limit
    # (16 MiB on v5e, 32 MiB on v6e / v7x).
    tile_bytes = (4 << 20) if "v5" in kind else (8 << 20)
    row_bytes = L * jnp.dtype(dtype).itemsize
    return int(max(8, (tile_bytes // row_bytes) // 8 * 8))


def _fc_head_2_pallas(x, w_eff, b_row, *, block_b):
    B, L = x.shape
    _, n_out = w_eff.shape

    # Batch tile: multiple of 8 (sublane aligned), and at most ~ceil(B/2) so the
    # 'parallel' grid always has >= 2 steps (both v7x TensorCores get work).
    half = 8 * pl.cdiv(pl.cdiv(B, 2), 8)
    bb = int(max(8, min(block_b, half)))
    grid = (pl.cdiv(B, bb),)   # ragged last block handled by the block machinery

    return pl.pallas_call(
        fc_head_2_kernel,
        out_shape=jax.ShapeDtypeStruct((B, n_out), jnp.float32),
        grid=grid,
        in_specs=[
            pl.BlockSpec((bb, L), lambda i: (i, 0)),       # stream x over the batch
            pl.BlockSpec((L, n_out), lambda i: (0, 0)),    # weight stays VMEM-resident
            pl.BlockSpec((1, n_out), lambda i: (0, 0)),    # bias stays VMEM-resident
        ],
        out_specs=pl.BlockSpec((bb, n_out), lambda i: (i, 0)),
        compiler_params=pltpu.CompilerParams(
            dimension_semantics=("parallel",)),
    )(x, w_eff, b_row)


def _fc_head_2_xla(x, w_eff, b_row):
    return jnp.dot(x, w_eff, preferred_element_type=jnp.float32) + b_row


def fc_head_2_forward(x, w_eff, b_row, *, block_b=None, min_pallas_batch=1024):
    """x: (B, 4*input_num); w_eff: (4*input_num, output_num); b_row: (1, output_num)."""
    B, L = x.shape
    Lw, n_out = w_eff.shape
    assert L == Lw, f"expected x last dim == 4*input_num == {Lw}, got {L}"

    if B < min_pallas_batch:
        # Tiny batch: a single grid step of sub-microsecond work would be pure
        # pallas_call launch overhead; let XLA fuse it.
        return _fc_head_2_xla(x, w_eff, b_row)

    if block_b is None:
        block_b = _default_block_b(L, x.dtype)
    return _fc_head_2_pallas(x, w_eff, b_row, block_b=block_b)


def fc_head_2_reference(x, weight, bias):
    B, L = x.shape
    n_out, n_in = weight.shape
    pooled = x.reshape(B, n_in, 4).mean(axis=-1)   # AvgPool1d(4, stride=4)
    return pooled @ weight.T + bias


if __name__ == "__main__":
    # Small shapes consistent with the module: input_num=32 -> x has 4*32 = 128 cols.
    input_num = 32
    output_num = 8
    L = 4 * input_num

    key = jax.random.PRNGKey(0)
    kx1, kx2, kw, kb = jax.random.split(key, 4)

    # Deterministic PyTorch-Linear-style init: U(-1/sqrt(in), 1/sqrt(in)).
    bound = 1.0 / (input_num ** 0.5)
    weight = jax.random.uniform(kw, (output_num, input_num), dtype=jnp.float32,
                                minval=-bound, maxval=bound)
    bias = jax.random.uniform(kb, (output_num,), dtype=jnp.float32,
                              minval=-bound, maxval=bound)

    # One-time parameter prep (pool folded into the weight), then the hot path.
    w_eff, b_row = prepare_fc_head_2_params(weight, bias)

    # (1) Tiny batch -> XLA fallback path.
    x_small = jax.random.normal(kx1, (2, L), dtype=jnp.float32)
    out_small = jax.block_until_ready(fc_head_2_forward(x_small, w_eff, b_row))
    ref_small = fc_head_2_reference(x_small, weight, bias)
    assert out_small.shape == (2, output_num)
    assert jnp.allclose(out_small, ref_small, atol=2e-5, rtol=2e-5), "small-B mismatch"

    # (2) Pallas path: multi-step grid with a ragged last block (300 = 2*128 + 44).
    x_big = jax.random.normal(kx2, (300, L), dtype=jnp.float32)
    out_big = jax.block_until_ready(
        fc_head_2_forward(x_big, w_eff, b_row, block_b=128, min_pallas_batch=0))
    ref_big = fc_head_2_reference(x_big, weight, bias)
    assert out_big.shape == (300, output_num)
    assert jnp.allclose(out_big, ref_big, atol=2e-5, rtol=2e-5), "pallas mismatch"

    # (3) Pallas path with the default (budget-derived, >=2-step) tiling.
    out_def = jax.block_until_ready(
        fc_head_2_forward(x_big, w_eff, b_row, min_pallas_batch=0))
    assert jnp.allclose(out_def, ref_big, atol=2e-5, rtol=2e-5), "default-tile mismatch"

    print("KERNEL_OK")
</pallas_src>

<mosaic_0001>
module attributes {stable_mosaic.version = 11 : i64} {
  func.func @fc_head_2_kernel(%arg0: i32, %arg1: memref<128x128xf32, #tpu.memory_space<vmem>>, %arg2: memref<128x8xf32, #tpu.memory_space<vmem>>, %arg3: memref<1x8xf32, #tpu.memory_space<vmem>>, %arg4: memref<128x8xf32, #tpu.memory_space<vmem>>) attributes {dimension_semantics = [#tpu.dimension_semantics<parallel>], iteration_bounds = array<i64: 3>, scalar_prefetch = 0 : i64, scratch_operands = 0 : i64, tpu.core_type = #tpu.core_type<tc>, window_params = [{transform_indices = @transform_0, window_bounds = array<i64: 128, 128>}, {pipeline_mode = #tpu.pipeline_mode<synchronous>, transform_indices = @transform_1, window_bounds = array<i64: 128, 8>}, {pipeline_mode = #tpu.pipeline_mode<synchronous>, transform_indices = @transform_2, window_bounds = array<i64: 1, 8>}, {transform_indices = @transform_3, window_bounds = array<i64: 128, 8>}]} {
    %c0 = arith.constant 0 : index
    %c0_0 = arith.constant 0 : index
    %0 = vector.load %arg1[%c0, %c0_0] : memref<128x128xf32, #tpu.memory_space<vmem>>, vector<128x128xf32>
    %c0_1 = arith.constant 0 : index
    %c0_2 = arith.constant 0 : index
    %1 = vector.load %arg2[%c0_1, %c0_2] : memref<128x8xf32, #tpu.memory_space<vmem>>, vector<128x8xf32>
    %cst = arith.constant dense<0.000000e+00> : vector<128x8xf32>
    %2 = tpu.matmul %0, %1, %cst {dimension_numbers = #tpu.dot_dimension_numbers<[1], [0], [0], [1], [0, 0, 1, 1], [], []>} : vector<128x128xf32>, vector<128x8xf32>, vector<128x8xf32> -> vector<128x8xf32>
    %c0_3 = arith.constant 0 : index
    %c0_4 = arith.constant 0 : index
    %3 = vector.load %arg3[%c0_3, %c0_4] : memref<1x8xf32, #tpu.memory_space<vmem>>, vector<1x8xf32>
    %4 = vector.broadcast %3 : vector<1x8xf32> to vector<128x8xf32>
    %5 = arith.addf %2, %4 : vector<128x8xf32>
    %c0_5 = arith.constant 0 : index
    %c0_6 = arith.constant 0 : index
    %6 = vector.load %arg4[%c0_5, %c0_6] : memref<128x8xf32, #tpu.memory_space<vmem>>, vector<128x8xf32>
    tpu.vector_store %arg4[%c0_5, %c0_6], %5 {strides = array<i32>} : memref<128x8xf32, #tpu.memory_space<vmem>>, vector<128x8xf32>,
    return
  }
  func.func @transform_0(%arg0: i32) -> (i32, i32) {
    %c0_i32 = arith.constant 0 : i32
    %c0_i32_0 = arith.constant 0 : i32
    return %arg0, %c0_i32 : i32, i32
  }
  func.func @transform_1(%arg0: i32) -> (i32, i32) {
    %c0_i32 = arith.constant 0 : i32
    %c0_i32_0 = arith.constant 0 : i32
    %c0_i32_1 = arith.constant 0 : i32
    return %c0_i32, %c0_i32_0 : i32, i32
  }
  func.func @transform_2(%arg0: i32) -> (i32, i32) {
    %c0_i32 = arith.constant 0 : i32
    %c0_i32_0 = arith.constant 0 : i32
    %c0_i32_1 = arith.constant 0 : i32
    return %c0_i32, %c0_i32_0 : i32, i32
  }
  func.func @transform_3(%arg0: i32) -> (i32, i32) {
    %c0_i32 = arith.constant 0 : i32
    %c0_i32_0 = arith.constant 0 : i32
    return %arg0, %c0_i32 : i32, i32
  }
}

</mosaic_0001>

<bundles_post_ra>
// kernel: tpu_custom_call.1
= control target key start
LH: loop header
LB: loop body
LE: loop exit
PB: predicated region body
PF: predicated region fallthrough
CT: control target
= control target key end

     0   :  { %8 = vsyncpa [#allocation3], 0  ;;  %s1264_s0 = inlined_call_operand.hbm [shape: f32[300,128], index: 0, kind: input, shape index: {}]   ;;  %s1265_s1 = inlined_call_operand.vmem [shape: f32[128,8], index: 1, kind: input, shape index: {}]   ;;  %s1266_s2 = inlined_call_operand.vmem [shape: f32[1,8], index: 2, kind: input, shape index: {}]   ;;  %s1267_s3 = inlined_call_operand.vmem [shape: f32[300,8], index: 3, kind: output, shape index: {}]  }
   0x1   :  { %10 = vsyncpa [#allocation3 + $0x1], 0  ;;  %s953_s12 = smov 0   ;;  %s955_s13 = smov 0  }
   0x2   :  { %s957_s14 = smov 0   ;;  %s959_s15 = smov 0  }
   0x3 LB: > { %s972_s16 = sadd.s32 4294967295, %s896_s15   ;;  %s975_s17 = sadd.s32 1, %s896_s15   ;;  %s896_s15 = sphi %s959_s15, %s1279_s15   ;;  %s892_s14 = sphi %s957_s14, %s1278_s14   ;;  %s888_s13 = sphi %s955_s13, %s1277_s13   ;;  %s884_s12 = sphi %s953_s12, %s1276_s12  }
   0x4   : > { %s20_s18 = ssub.s32 %s896_s15, %s975_s17  ;;  %s23_s19 = sadd.s32 1, %s892_s14 }
   0x5   : > { %p21_p0 = scmp.eq.s32.totalorder %s20_s18, 0  ;;  %p30_p1 = scmp.ne.s32.totalorder %s892_s14, %s888_s13 }
   0x6   : > { %p31_p2 = scmp.eq.s32.totalorder %s896_s15, 0  ;;  %p36_p3 = scmp.ne.s32.totalorder %s888_s13, %s884_s12 }
   0x7   : > { %s985_s20 = scalar_select %p21_p0, %s892_s14, %s23_s19  }
   0x8   : > { %p32_p4 = por %p31_p2, %p30_p1  ;;  %p37_p5 = scmp.eq.s32.totalorder %s972_s16, 0 }
   0x9   : > { %p102_p6 = scmp.eq.s32.totalorder %s972_s16, 2  ;;  %p611_p9 = scmp.ge.s32.totalorder %s896_s15, 3 }
   0xa   : > { %p989_p7 = por %p37_p5, %p36_p3 }
   0xb   : > { %p993_p8 = por %p102_p6, %p30_p1  ;;  %130 = sbr.rel (%p611_p9) target bundleno = 52 (0x34), region = 24 }
  0x10   : > { %133 = sbr.rel (!%p32_p4) target bundleno = 52 (0x34), region = 28  ;;  %s134_s23 = sand.u32 (%p32_p4), 1, %s892_s14  }
  0x11   : > { %s613_s24 = sshll.u32 (%p32_p4), %s896_s15, 4  ;;  %s612_s25 = sshll.u32 (%p32_p4), %s134_s23, 7 }
  0x12   : > { %s140_s26 = ssub.s32 (%p32_p4), 38, %s613_s24  ;;  %s1003_s30 = scalar_lea.sflag (%p32_p4), [#allocation3], %s134_s23 }
  0x13   : > { %p141_p10 = scmp.lt.s32.totalorder (%p32_p4), %s140_s26, 16  ;;  %s138_s4 = scalar_lea.vmem (%p32_p4), [#allocation2], %s612_s25 }
  0x15   : > { %s1281_s26 = smov (!%p141_p10, %s140_s26), 16 }
  0x16   : > { %s614_s27 = sshll.u32 %s1281_s26, 3 }
  0x17   : > { %s144_s28 = ssub.s32 128, %s614_s27 }
  0x18   : > { %s145_s29 = sshll.u32 %s144_s28, 4 }
  0x19   : > { %146 = vsyncadd %s1003_s30, %s145_s29  ;;  %p1006_p11 = scmp.ne.s32.totalorder %s614_s27, 0  ;;  %s639_s6 = sshll.u32 %s896_s15, 7 }
  0x1a   : > { %s149_s9 = scalar_lea.hbm %s1264_s0, %s639_s6  ;;  %s1014_s10 = sshll.u32 %s138_s4, 4  ;;  %s154_s10 = int_to_ptr.vmem [resolvable:$true] %s1014_s10 }
  0x1b   : > { %s151_s11 = sshll.u32 %s149_s9, 4  ;;  %s618_s12 = sshll.u32 %s1281_s26, 7  ;;  %s1017_s11 = int_to_ptr.hbm [resolvable:$true] %s151_s11 }
  0x1c   : > { %s791_s18 = sshra.s32 %s1017_s11, 4  ;;  %s793_s19 = sshrl.u32 %s618_s12, 4  ;;  %s792_s18 = int_to_ptr.hbm [resolvable:$true] %s791_s18 }
  0x1d   : > { %s798_s23 = scalar_lea.hbm %s792_s18, %s793_s19  ;;  %s802_s27 = scalar_lea.hbm %s1264_s0, 304 }
  0x1e   : > { %p799_p12 = scmp.ne.s32.totalorder %s792_s18, %s798_s23  ;;  %p803_p1 = scmp.lt.s32.totalorder %s792_s18, %s1264_s0 }
  0x1f   : > { %p804_p2 = scmp.lt.s32.totalorder %s802_s27, %s798_s23 }
  0x20   : > { %p800_p13 = pnand %p799_p12, %p1006_p11 }
  0x21   : > { %p805_p3 = por %p804_p2, %p803_p1 }
  0x22   : > { %p801_p0 = pneg %p800_p13 }
  0x24   : > { %p806_p4 = pnand %p805_p3, %p801_p0 }
  0x26   : > { %809 = shalt.err (!%p806_p4)
}
  0x27   : > { %s810_s4 = sshra.s32 %s154_s10, 4  ;;  %s930_s7 = smov [#allocation2]   ;;  %s811_s4 = int_to_ptr.vmem [resolvable:$true] %s810_s4 }
  0x28   : > { %s817_s6 = scalar_lea.vmem %s811_s4, %s793_s19  ;;  %s821_s8 = scalar_lea.vmem %s930_s7, 256 }
  0x29   : > { %p818_p5 = scmp.ne.s32.totalorder %s811_s4, %s817_s6  ;;  %p823_p10 = scmp.lt.s32.totalorder %s821_s8, %s817_s6 }
  0x2b   : > { %p819_p6 = pnand %p818_p5, %p1006_p11 }
  0x2d   : > { %p820_p9 = pneg %p819_p6 }
  0x2f   : > { %p825_p12 = pnand %p823_p10, %p820_p9 }
  0x31   : > { %828 = shalt.err (!%p825_p12)
}
  0x32   : > { %s931_s9 = smov 128   ;;  %s932_s18 = smov 8  }
  0x33   : > { %159 = dma.hbm_to_vmem [thread:$0]  (%p1006_p11), %s1017_s11, %s618_s12, %s154_s10, %s1003_s30, %s931_s9, %s931_s9, %s932_s18  }
  0x34 PF: > { %p619_p13 = scmp.ge.s32.totalorder %s896_s15, 1  ;;  %p161_p0 = scmp.lt.s32.totalorder %s896_s15, 4 }
  0x36   : > { %p162_p1 = pnand %p619_p13, %p161_p0 }
  0x37   : > { %s167_s19 = sand.u32 (!%p162_p1), 1, %s888_s13  }
  0x38   : > { %165 = sbr.rel (%p162_p1) target bundleno = 302 (0x12e), region = 32  ;;  %s1046_s23 = sshll.u32 (!%p162_p1), %s167_s19, 7 }
  0x39   : > { %s168_s24 = scalar_lea.sflag (!%p162_p1), [#allocation3], %s167_s19  ;;  %s1049_s25 = scalar_lea.vmem (!%p162_p1), [#allocation2], %s1046_s23 }
  0x3d   : > { %879 = dma.done.wait (%p989_p7), %s168_s24, 2048  }
  0x3e   : > { %881 = vsyncadd (%p989_p7), %s168_s24, 4294965248  ;;  %v235_v0 = vld [vmem:[%s1265_s1 + $0x78] sm:$0xff]  ;;  %v234_v1 = vld [vmem:[%s1265_s1 + $0x70] sm:$0xff]  ;;  %vm305_vm0 = vcmask 64512   ;;  %s1123_s9 = scalar_lea.vmem [#allocation4], %s1046_s23   ;;  %s623_s23 = sshll.u32 (%p993_p8), %s972_s16, 4 }
  0x3f   : > { %644 = vmatpush.msra.mxu2 %v235_v0  ;;  %645 = vmatpush.msra.mxu3 %v235_v0  ;;  %v233_v2 = vld [vmem:[%s1265_s1 + $0x68] sm:$0xff]  ;;  %v232_v3 = vld [vmem:[%s1265_s1 + $0x60] sm:$0xff]  ;;  %v231_v4 = vld [vmem:[%s1265_s1 + $0x58] sm:$0xff]  ;;  %s330_s18 = ssub.s32 (%p993_p8), 38, %s623_s23 }
  0x40   : > { %240 = vmatpush.msra.mxu0 %v235_v0  ;;  %643 = vmatpush.msra.mxu1 %v235_v0  ;;  %v230_v5 = vld [vmem:[%s1265_s1 + $0x50] sm:$0xff]  ;;  %v229_v6 = vld [vmem:[%s1265_s1 + $0x48] sm:$0xff]  ;;  %v228_v7 = vld [vmem:[%s1265_s1 + $0x40] sm:$0xff]  ;;  %p331_p7 = scmp.lt.s32.totalorder (%p993_p8), %s330_s18, 16 }
  0x41   : > { %647 = vmatpush.msra.mxu2 %v234_v1  ;;  %648 = vmatpush.msra.mxu3 %v234_v1  ;;  %v227_v8 = vld [vmem:[%s1265_s1 + $0x38] sm:$0xff]  ;;  %v226_v9 = vld [vmem:[%s1265_s1 + $0x30] sm:$0xff]  ;;  %v225_v10 = vld [vmem:[%s1265_s1 + $0x28] sm:$0xff] }
  0x42   : > { %241 = vmatpush.msra.mxu0 %v234_v1  ;;  %646 = vmatpush.msra.mxu1 %v234_v1  ;;  %v224_v11 = vld [vmem:[%s1265_s1 + $0x20] sm:$0xff]  ;;  %v223_v12 = vld [vmem:[%s1265_s1 + $0x18] sm:$0xff]  ;;  %v222_v13 = vld [vmem:[%s1265_s1 + $0x10] sm:$0xff] }
  0x43   : > { %650 = vmatpush.msra.mxu2 %v233_v2  ;;  %651 = vmatpush.msra.mxu3 %v233_v2  ;;  %v221_v14 = vld [vmem:[%s1265_s1 + $0x8] sm:$0xff]  ;;  %v220_v15 = vld [vmem:[%s1265_s1] sm:$0xff]  ;;  %v214_v24 = vld [vmem:[%s1049_s25 + $0x50] sm:$0xff] }
  0x44   : > { %242 = vmatpush.msra.mxu0 %v233_v2  ;;  %649 = vmatpush.msra.mxu1 %v233_v2  ;;  %v212_v16 = vld [vmem:[%s1049_s25 + $0x40] sm:$0xff]  ;;  %v213_v20 = vld [vmem:[%s1049_s25 + $0x48] sm:$0xff]  ;;  %v218_v25 = vld [vmem:[%s1049_s25 + $0x70] sm:$0xff] }
  0x45   : > { %653 = vmatpush.msra.mxu2 %v232_v3  ;;  %654 = vmatpush.msra.mxu3 %v232_v3  ;;  %v216_v17 = vld [vmem:[%s1049_s25 + $0x60] sm:$0xff]  ;;  %v217_v21 = vld [vmem:[%s1049_s25 + $0x68] sm:$0xff]  ;;  %v206_v26 = vld [vmem:[%s1049_s25 + $0x10] sm:$0xff] }
  0x46   : > { %243 = vmatpush.msra.mxu0 %v232_v3  ;;  %652 = vmatpush.msra.mxu1 %v232_v3  ;;  %v204_v18 = vld [vmem:[%s1049_s25] sm:$0xff]  ;;  %v205_v22 = vld [vmem:[%s1049_s25 + $0x8] sm:$0xff]  ;;  %v210_v27 = vld [vmem:[%s1049_s25 + $0x30] sm:$0xff] }
  0x47   : > { %656 = vmatpush.msra.mxu2 %v231_v4  ;;  %657 = vmatpush.msra.mxu3 %v231_v4  ;;  %v208_v19 = vld [vmem:[%s1049_s25 + $0x20] sm:$0xff]  ;;  %v209_v23 = vld [vmem:[%s1049_s25 + $0x28] sm:$0xff]  ;;  %v215_v28 = vld [vmem:[%s1049_s25 + $0x58] sm:$0xff] }
  0x48   : > { %244 = vmatpush.msra.mxu0 %v231_v4  ;;  %655 = vmatpush.msra.mxu1 %v231_v4  ;;  %v219_v29 = vld [vmem:[%s1049_s25 + $0x78] sm:$0xff]  ;;  %v790_v32 = vld [vmem:[%s1266_s2] ss:$0 sm:$0xff] }
  0x49   : > { %659 = vmatpush.msra.mxu2 %v230_v5  ;;  %660 = vmatpush.msra.mxu3 %v230_v5  ;;  %v207_v30 = vld [vmem:[%s1049_s25 + $0x18] sm:$0xff] }
  0x4a   : > { %245 = vmatpush.msra.mxu0 %v230_v5  ;;  %658 = vmatpush.msra.mxu1 %v230_v5  ;;  %v211_v31 = vld [vmem:[%s1049_s25 + $0x38] sm:$0xff]  ;;  %s640_s25 = sshll.u32 (%p993_p8), %s972_s16, 7 }
  0x4b   : > { %662 = vmatpush.msra.mxu2 %v229_v6  ;;  %663 = vmatpush.msra.mxu3 %v229_v6  ;;  %s1164_s26 = scalar_lea.vmem (%p993_p8), %s1267_s3, %s640_s25  }
  0x4c   : > { %246 = vmatpush.msra.mxu0 %v229_v6  ;;  %661 = vmatpush.msra.mxu1 %v229_v6 }
  0x4d   : > { %665 = vmatpush.msra.mxu2 %v228_v7  ;;  %666 = vmatpush.msra.mxu3 %v228_v7 }
  0x4e   : > { %247 = vmatpush.msra.mxu0 %v228_v7  ;;  %664 = vmatpush.msra.mxu1 %v228_v7 }
  0x4f   : > { %668 = vmatpush.msra.mxu2 %v227_v8  ;;  %669 = vmatpush.msra.mxu3 %v227_v8 }
  0x50   : > { %248 = vmatpush.msra.mxu0 %v227_v8  ;;  %667 = vmatpush.msra.mxu1 %v227_v8 }
  0x51   : > { %671 = vmatpush.msra.mxu2 %v226_v9  ;;  %672 = vmatpush.msra.mxu3 %v226_v9 }
  0x52   : > { %249 = vmatpush.msra.mxu0 %v226_v9  ;;  %670 = vmatpush.msra.mxu1 %v226_v9 }
  0x53   : > { %674 = vmatpush.msra.mxu2 %v225_v10  ;;  %675 = vmatpush.msra.mxu3 %v225_v10 }
  0x54   : > { %250 = vmatpush.msra.mxu0 %v225_v10  ;;  %673 = vmatpush.msra.mxu1 %v225_v10 }
  0x55   : > { %677 = vmatpush.msra.mxu2 %v224_v11  ;;  %678 = vmatpush.msra.mxu3 %v224_v11 }
  0x56   : > { %251 = vmatpush.msra.mxu0 %v224_v11  ;;  %676 = vmatpush.msra.mxu1 %v224_v11 }
  0x57   : > { %680 = vmatpush.msra.mxu2 %v223_v12  ;;  %681 = vmatpush.msra.mxu3 %v223_v12 }
  0x58   : > { %252 = vmatpush.msra.mxu0 %v223_v12  ;;  %679 = vmatpush.msra.mxu1 %v223_v12 }
  0x59   : > { %683 = vmatpush.msra.mxu2 %v222_v13  ;;  %684 = vmatpush.msra.mxu3 %v222_v13 }
  0x5a   : > { %253 = vmatpush.msra.mxu0 %v222_v13  ;;  %682 = vmatpush.msra.mxu1 %v222_v13 }
  0x5b   : > { %686 = vmatpush.msra.mxu2 %v221_v14  ;;  %687 = vmatpush.msra.mxu3 %v221_v14 }
  0x5c   : > { %254 = vmatpush.msra.mxu0 %v221_v14  ;;  %685 = vmatpush.msra.mxu1 %v221_v14 }
  0x5d   : > { %689 = vmatpush.msra.mxu2 %v220_v15  ;;  %690 = vmatpush.msra.mxu3 %v220_v15 }
  0x5e   : > { %280 = vmatmul.f32.vlgmr.msra.gmra.mxu2 %v212_v16  ;;  %292 = vmatmul.f32.vlgmr.msra.gmra.mxu3 %v216_v17 }
  0x5f   : > { %255 = vmatpush.msra.mxu0 %v220_v15  ;;  %688 = vmatpush.msra.mxu1 %v220_v15 }
  0x60   : > { %256 = vmatmul.f32.vlgmr.msra.gmra.mxu0 %v204_v18  ;;  %268 = vmatmul.f32.vlgmr.msra.gmra.mxu1 %v208_v19 }
  0x66   : > { %283 = vmatmul.f32.gmra.mxu2 %v213_v20  ;;  %295 = vmatmul.f32.gmra.mxu3 %v217_v21 }
  0x68   : > { %259 = vmatmul.f32.gmra.mxu0 %v205_v22  ;;  %271 = vmatmul.f32.gmra.mxu1 %v209_v23 }
  0x6e   : > { %286 = vmatmul.f32.gmra.mxu2 %v214_v24  ;;  %298 = vmatmul.f32.gmra.mxu3 %v218_v25 }
  0x70   : > { %262 = vmatmul.f32.gmra.mxu0 %v206_v26  ;;  %274 = vmatmul.f32.gmra.mxu1 %v210_v27 }
  0x76   : > { %289 = vmatmul.f32.gmra.mxu2 %v215_v28  ;;  %301 = vmatmul.f32.gmra.mxu3 %v219_v29 }
  0x78   : > { %265 = vmatmul.f32.gmra.mxu0 %v207_v30  ;;  %277 = vmatmul.f32.gmra.mxu1 %v211_v31 }
  0xdd   : > { %v257_v33 = vpop.f32.mrf.mxu0  ;;  %v269_v34 = vpop.f32.mrf.mxu1 }
  0xde   : > { %v258_v35 = vadd.f32 %v790_v32, %v257_v33  ;;  %v270_v36 = vadd.f32 %v790_v32, %v269_v34 }
  0xe0   : > { %306 = vst.msk [vmem:[%s1123_s9] sm:$0xff] %vm305_vm0, %v258_v35 }
  0xe1   : > { %310 = vst.msk [vmem:[%s1123_s9 + $0x20] sm:$0xff] %vm305_vm0, %v270_v36  ;;  %v281_v37 = vpop.f32.mrf.mxu2  ;;  %v293_v38 = vpop.f32.mrf.mxu3 }
  0xe2   : > { %v282_v39 = vadd.f32 %v790_v32, %v281_v37  ;;  %v294_v40 = vadd.f32 %v790_v32, %v293_v38 }
  0xe4   : > { %314 = vst.msk [vmem:[%s1123_s9 + $0x40] sm:$0xff] %vm305_vm0, %v282_v39 }
  0xe5   : > { %318 = vst.msk [vmem:[%s1123_s9 + $0x60] sm:$0xff] %vm305_vm0, %v294_v40  ;;  %v260_v41 = vpop.f32.mrf.mxu0  ;;  %v272_v42 = vpop.f32.mrf.mxu1 }
  0xe6   : > { %v261_v43 = vadd.f32 %v790_v32, %v260_v41  ;;  %v273_v44 = vadd.f32 %v790_v32, %v272_v42 }
  0xe8   : > { %307 = vst.msk [vmem:[%s1123_s9 + $0x8] sm:$0xff] %vm305_vm0, %v261_v43 }
  0xe9   : > { %311 = vst.msk [vmem:[%s1123_s9 + $0x28] sm:$0xff] %vm305_vm0, %v273_v44  ;;  %v284_v45 = vpop.f32.mrf.mxu2  ;;  %v296_v46 = vpop.f32.mrf.mxu3 }
  0xea   : > { %v285_v47 = vadd.f32 %v790_v32, %v284_v45  ;;  %v297_v48 = vadd.f32 %v790_v32, %v296_v46 }
  0xec   : > { %315 = vst.msk [vmem:[%s1123_s9 + $0x48] sm:$0xff] %vm305_vm0, %v285_v47 }
  0xed   : > { %319 = vst.msk [vmem:[%s1123_s9 + $0x68] sm:$0xff] %vm305_vm0, %v297_v48  ;;  %v263_v49 = vpop.f32.mrf.mxu0  ;;  %v275_v50 = vpop.f32.mrf.mxu1 }
  0xee   : > { %v264_v51 = vadd.f32 %v790_v32, %v263_v49  ;;  %v276_v52 = vadd.f32 %v790_v32, %v275_v50 }
  0xf0   : > { %308 = vst.msk [vmem:[%s1123_s9 + $0x10] sm:$0xff] %vm305_vm0, %v264_v51 }
  0xf1   : > { %312 = vst.msk [vmem:[%s1123_s9 + $0x30] sm:$0xff] %vm305_vm0, %v276_v52  ;;  %v287_v53 = vpop.f32.mrf.mxu2  ;;  %v299_v54 = vpop.f32.mrf.mxu3 }
  0xf2   : > { %v288_v55 = vadd.f32 %v790_v32, %v287_v53  ;;  %v300_v56 = vadd.f32 %v790_v32, %v299_v54 }
  0xf4   : > { %316 = vst.msk [vmem:[%s1123_s9 + $0x50] sm:$0xff] %vm305_vm0, %v288_v55 }
  0xf5   : > { %320 = vst.msk [vmem:[%s1123_s9 + $0x70] sm:$0xff] %vm305_vm0, %v300_v56  ;;  %v266_v57 = vpop.f32.mrf.mxu0  ;;  %v278_v58 = vpop.f32.mrf.mxu1 }
  0xf6   : > { %v267_v59 = vadd.f32 %v790_v32, %v266_v57  ;;  %v279_v60 = vadd.f32 %v790_v32, %v278_v58 }
  0xf8   : > { %309 = vst.msk [vmem:[%s1123_s9 + $0x18] sm:$0xff] %vm305_vm0, %v267_v59 }
  0xf9   : > { %313 = vst.msk [vmem:[%s1123_s9 + $0x38] sm:$0xff] %vm305_vm0, %v279_v60  ;;  %v290_v61 = vpop.f32.mrf.mxu2  ;;  %v302_v62 = vpop.f32.mrf.mxu3  ;;  %328 = sbr.rel (!%p993_p8) target bundleno = 302 (0x12e), region = 40 }
  0xfa   : > { %v291_v63 = vadd.f32 %v790_v32, %v290_v61  ;;  %v303_v0 = vadd.f32 %v790_v32, %v302_v62 }
  0xfc   : > { %317 = vst.msk [vmem:[%s1123_s9 + $0x58] sm:$0xff] %vm305_vm0, %v291_v63 }
  0xfd   : > { %321 = vst.msk [vmem:[%s1123_s9 + $0x78] sm:$0xff] %vm305_vm0, %v303_v0 }
  0xfe   : > { %s1283_s18 = smov (!%p331_p7, %s330_s18), 16 }
  0xff   : > { %s624_s30 = sshll.u32 %s1283_s18, 3 }
 0x100   : > { %p627_p11 = scmp.eq.s32.totalorder %s624_s30, 0 }
 0x101   : > { %s1170_s22 = sshrl.u32 (!%p627_p11), %s1283_s18, 4 }
 0x102   : > { %339 = sbr.rel (%p627_p11) target bundleno = 302 (0x12e), region = 44  ;;  %p628_p8 = scmp.le.s32.totalorder (!%p627_p11), %s1170_s22, 0 }
 0x107   : > { %562 = sbr.rel (%p628_p8) target bundleno = 285 (0x11d), region = 126  ;;  %s1271_s16 = smov (!%p628_p8), %s1164_s26 }
 0x108   : > { %s1272_s15 = smov (!%p628_p8), %s1123_s9  ;;  %s1179_s5 = smov (!%p628_p8), 0  }
 0x109   : > { %s1181_s10 = smov (!%p628_p8), 0  }
 0x10c LB: >> { %v432_v1 = vld [vmem:[%s904_s15] sm:$0xff]  ;;  %v434_v2 = vld [vmem:[%s904_s15 + $0x8] sm:$0xff]  ;;  %v436_v3 = vld [vmem:[%s904_s15 + $0x10] sm:$0xff]  ;;  %s464_s11 = sadd.s32 1, %s908_s5  ;;  %s426_s10 = sadd.s32 1, %s912_s10   ;;  %s912_s10 = sphi %s1181_s10, %s426_s10   ;;  %s908_s5 = sphi %s1179_s5, %s1275_s5   ;;  %s904_s15 = sphi %s1272_s15, %s1274_s15   ;;  %s900_s16 = sphi %s1271_s16, %s1273_s16  }
 0x10d   : >> { %433 = vst [vmem:[%s900_s16] sm:$0xff] %v432_v1  ;;  %v438_v4 = vld [vmem:[%s904_s15 + $0x18] sm:$0xff]  ;;  %p465_p2 = scmp.ge.s32.totalorder %s464_s11, %s1170_s22  ;;  %v440_v5 = vld [vmem:[%s904_s15 + $0x20] sm:$0xff]  ;;  %v442_v6 = vld [vmem:[%s904_s15 + $0x28] sm:$0xff]  ;;  %p425_p3 = scmp.ge.s32.totalorder %s426_s10, %s1170_s22 }
 0x10e   : >> { %435 = vst [vmem:[%s900_s16 + $0x8] sm:$0xff] %v434_v2  ;;  %v444_v7 = vld [vmem:[%s904_s15 + $0x30] sm:$0xff]  ;;  %v446_v8 = vld [vmem:[%s904_s15 + $0x38] sm:$0xff]  ;;  %v448_v9 = vld [vmem:[%s904_s15 + $0x40] sm:$0xff] }
 0x10f   : >> { %437 = vst [vmem:[%s900_s16 + $0x10] sm:$0xff] %v436_v3  ;;  %s1285_s11 = smov (%p465_p2, %s464_s11), 0  ;;  %v450_v10 = vld [vmem:[%s904_s15 + $0x48] sm:$0xff]  ;;  %v452_v11 = vld [vmem:[%s904_s15 + $0x50] sm:$0xff]  ;;  %v454_v12 = vld [vmem:[%s904_s15 + $0x58] sm:$0xff] }
 0x110   : >> { %439 = vst [vmem:[%s900_s16 + $0x18] sm:$0xff] %v438_v4  ;;  %s629_s21 = sshll.u32 %s1285_s11, 7  ;;  %v456_v13 = vld [vmem:[%s904_s15 + $0x60] sm:$0xff]  ;;  %v458_v14 = vld [vmem:[%s904_s15 + $0x68] sm:$0xff]  ;;  %v460_v15 = vld [vmem:[%s904_s15 + $0x70] sm:$0xff]  ;;  %s1275_s5 = smov %s1285_s11 }
 0x111   : >> { %441 = vst [vmem:[%s900_s16 + $0x20] sm:$0xff] %v440_v5  ;;  %s469_s12 = scalar_lea.vmem %s1123_s9, %s629_s21 [#allocation4]   ;;  %s470_s27 = scalar_lea.vmem %s1164_s26, %s629_s21   ;;  %v462_v16 = vld [vmem:[%s904_s15 + $0x78] sm:$0xff] }
 0x112   : >> { %443 = vst [vmem:[%s900_s16 + $0x28] sm:$0xff] %v442_v6  ;;  %s1274_s15 = smov %s469_s12 }
 0x113   : >> { %445 = vst [vmem:[%s900_s16 + $0x30] sm:$0xff] %v444_v7 }
 0x114   : >> { %447 = vst [vmem:[%s900_s16 + $0x38] sm:$0xff] %v446_v8 }
 0x115   : >> { %449 = vst [vmem:[%s900_s16 + $0x40] sm:$0xff] %v448_v9 }
 0x116   : >> { %451 = vst [vmem:[%s900_s16 + $0x48] sm:$0xff] %v450_v10 }
 0x117   : >> { %453 = vst [vmem:[%s900_s16 + $0x50] sm:$0xff] %v452_v11 }
 0x118   : >> { %455 = vst [vmem:[%s900_s16 + $0x58] sm:$0xff] %v454_v12  ;;  %428 = sbr.rel (!%p425_p3) target bundleno = 268 (0x10c), region = 132 }
 0x119   : >> { %457 = vst [vmem:[%s900_s16 + $0x60] sm:$0xff] %v456_v13 }
 0x11a   : >> { %459 = vst [vmem:[%s900_s16 + $0x68] sm:$0xff] %v458_v14 }
 0x11b   : >> { %461 = vst [vmem:[%s900_s16 + $0x70] sm:$0xff] %v460_v15 }
 0x11c   : >> { %463 = vst [vmem:[%s900_s16 + $0x78] sm:$0xff] %v462_v16  ;;  %s1273_s16 = smov %s470_s27 }
 0x11d PF: > { %s1243_s28 = sand.u32 15, %s1283_s18   ;;  %s641_s29 = sshll.u32 %s1170_s22, 7 }
 0x11e   : > { %s475_s4 = scalar_lea.vmem %s1123_s9, %s641_s29 [#allocation4]   ;;  %s477_s6 = scalar_lea.vmem %s1164_s26, %s641_s29  }
 0x11f   : > { %p634_p4 = scmp.le.s32.totalorder %s1243_s28, 0 }
 0x120   : > { %s914_s7 = smov (!%p634_p4), %s477_s6   ;;  %s918_s8 = smov (!%p634_p4), %s475_s4  }
 0x121   : > { %576 = sbr.rel (%p634_p4) target bundleno = 302 (0x12e), region = 137  ;;  %s922_s23 = smov (!%p634_p4), 0  }
 0x122   : > { %s926_s25 = smov (!%p634_p4), 0  }
 0x126 LB: >> { %v487_v17 = vld [vmem:[%s920_s8] sm:$0xff]  ;;  %s489_s18 = sadd.s32 1, %s924_s23  ;;  %s481_s25 = sadd.s32 1, %s928_s25   ;;  %s928_s25 = sphi %s926_s25, %s481_s25   ;;  %s924_s23 = sphi %s922_s23, %s923_s23   ;;  %s920_s8 = sphi %s918_s8, %s494_s8   ;;  %s916_s7 = sphi %s914_s7, %s495_s7  }
 0x127   : >> { %488 = vst [vmem:[%s916_s7] sm:$0xff] %v487_v17  ;;  %p490_p5 = scmp.ge.s32.totalorder %s489_s18, %s1243_s28  ;;  %p480_p6 = scmp.ge.s32.totalorder %s481_s25, %s1243_s28 }
 0x129   : >> { %s1287_s18 = smov (%p490_p5, %s489_s18), 0  ;;  %483 = sbr.rel (!%p480_p6) target bundleno = 294 (0x126), region = 143 }
 0x12a   : >> { %s635_s9 = sshll.u32 %s1287_s18, 3  ;;  %s923_s23 = smov %s1287_s18  }
 0x12b   : >> { %s494_s8 = scalar_lea.vmem %s475_s4, %s635_s9 [#allocation4]   ;;  %s495_s7 = scalar_lea.vmem %s477_s6, %s635_s9  }
 0x12e PF: > { %p13_p9 = scmp.ge.s32.totalorder %s975_s17, 5   ;;  %s1276_s12 = smov %s888_s13 }
 0x12f   : > { %s1277_s13 = smov %s892_s14  ;;  %s1278_s14 = smov %s985_s20 }
 0x130   : > { %s1279_s15 = smov %s975_s17  ;;  %15 = sbr.rel (!%p13_p9) target bundleno = 3 (0x3), region = 154 }
 0x135   :  { %511 = vsyncpa [#allocation3], 1 }
 0x136   :  { %513 = vsyncpa [#allocation3 + $0x1], 1 }

</bundles_post_ra>
